<compile_context>
chip_gen: v7x
topology: tpu7x:2x2x1
jax: 0.10.0
libtpu: 0.0.40
codegen_flags: <defaults>
</compile_context>

<pallas_src>
import numpy as np
import jax
import jax.numpy as jnp
from jax.experimental import pallas as pl
from jax.experimental.pallas import tpu as pltpu

# ----------------------------- config (synthetic) -----------------------------
NUM_CLASS = 3
NUM_ANCHORS_PER_LOC = 2           # e.g. 1 size x 2 rotations
CODE_SIZE = 7                     # ResidualCoder default (no extra dims)
NUM_DIR_BINS = 2
DIR_OFFSET = 0.78539
DIR_LIMIT_OFFSET = 0.0
H = 16
W = 16
B = 2
N_ANCHORS = H * W * NUM_ANCHORS_PER_LOC   # 512
LANE = 128                                 # lanes per vreg row
MAX_TS = 512                               # up to 512*128 = 64K anchors / step
MIN_GRID_STEPS = 4                         # keep >=4 steps at production N (v7x)
PERIOD = 2.0 * np.pi / NUM_DIR_BINS
INV_PERIOD = 1.0 / PERIOD
VMEM_LIMIT_BYTES = 32 * 1024 * 1024        # raise v5e's 16 MiB default; fits v7x


def _round_up(x, m):
    return ((x + m - 1) // m) * m


# --------------------------------- kernel -------------------------------------
def _decode_kernel(box_ref, anc_ref, dir_ref, out_ref):
    """Decode residual-encoded boxes against anchors + dir-bin angle fix.

    box_ref : (CODE_SIZE, B, TS, 128)       residual box predictions (f32/bf16)
    anc_ref : (CODE_SIZE, TS, 128)          anchors (f32, batch-invariant)
    dir_ref : (NUM_DIR_BINS, B, TS, 128)    direction-classifier logits
    out_ref : (CODE_SIZE, B, TS, 128)       decoded boxes
    """
    f32 = jnp.float32

    def bch(i):                       # (B, TS, 128), upcast (bf16 inputs OK)
        return box_ref[i].astype(f32)

    def dch(i):
        return dir_ref[i].astype(f32)

    xa, ya, za = anc_ref[0], anc_ref[1], anc_ref[2]
    dxa, dya, dza = anc_ref[3], anc_ref[4], anc_ref[5]
    ra = anc_ref[6]
    # EUP sqrt is free under this mem-bound roofline; saves an anchor channel.
    diag = jnp.sqrt(dxa * dxa + dya * dya)

    # ResidualCoder.decode_torch (encode_angle_by_sincos=False, code_size=7).
    # Anchors (TS,128) broadcast against (B,TS,128); direct per-channel stores.
    out_ref[0] = (bch(0) * diag + xa).astype(out_ref.dtype)
    out_ref[1] = (bch(1) * diag + ya).astype(out_ref.dtype)
    out_ref[2] = (bch(2) * dza + za).astype(out_ref.dtype)
    out_ref[3] = (jnp.exp(bch(3)) * dxa).astype(out_ref.dtype)
    out_ref[4] = (jnp.exp(bch(4)) * dya).astype(out_ref.dtype)
    out_ref[5] = (jnp.exp(bch(5)) * dzt_scale(dza)).astype(out_ref.dtype)
    rg = bch(6) + ra

    # torch.max(dir_cls_preds, dim=-1)[1]  (ties -> first index, i.e. strict >)
    if NUM_DIR_BINS == 2:
        bin_off = jnp.where(dch(1) > dch(0), f32(PERIOD), f32(0.0))
    else:
        best_val = dch(0)
        best_idx = jnp.zeros_like(best_val)
        for i in range(1, NUM_DIR_BINS):
            cand = dch(i)
            better = cand > best_val
            best_val = jnp.where(better, cand, best_val)
            best_idx = jnp.where(better, jnp.float32(i), best_idx)
        bin_off = f32(PERIOD) * best_idx

    # common_utils.limit_period(rg - dir_offset, dir_limit_offset, period)
    val = rg - DIR_OFFSET
    dir_rot = val - jnp.floor(val * INV_PERIOD + DIR_LIMIT_OFFSET) * PERIOD
    out_ref[6] = (dir_rot + DIR_OFFSET + bin_off).astype(out_ref.dtype)


def dzt_scale(dza):
    # trivial helper so out_ref[5] line stays readable (jnp.exp(dzt)*dza)
    return dza


# ------------------------------ tiling helpers ---------------------------------
def tile_params(n, in_dtype=jnp.float32):
    """Lane-dense tiling: N anchors -> nbp rows of 128 lanes, tile height ts."""
    sub = 16 if in_dtype == jnp.bfloat16 else 8     # bf16 packs (16,128)/vreg
    nb = -(-n // LANE)                              # 128-lane rows of anchors
    ts = min(_round_up(nb, sub), MAX_TS)
    if nb >= MIN_GRID_STEPS * sub:
        # split into >= MIN_GRID_STEPS grid steps (keeps both v7x TCs streaming)
        ts = min(ts, _round_up(-(-nb // MIN_GRID_STEPS), sub))
    nbp = _round_up(nb, ts)
    return ts, nbp, nbp * LANE


def prepare_anchor_tiles(anchors, n_pad):
    """(N, 7) anchors -> channel-leading (7, n_pad//128, 128) static slab.

    Precompute this ONCE (outside the per-step call); it is batch-invariant.
    """
    n = anchors.shape[0]
    anc = anchors.astype(jnp.float32).T                      # (7, N)
    if n_pad > n:
        anc = jnp.pad(anc, ((0, 0), (0, n_pad - n)))
    return anc.reshape(CODE_SIZE, n_pad // LANE, LANE)


# --------------------------------- wrapper -------------------------------------
def generate_predicted_boxes(cls_preds, box_preds, dir_cls_preds, anchors,
                             *, in_dtype=jnp.float32, out_dtype=jnp.float32,
                             anchor_tiles=None):
    """JAX/Pallas equivalent of AnchorHeadTemplate.generate_predicted_boxes.

    cls_preds     : (B, H, W, A*num_class)    (NHWC, i.e. NCHW conv output permuted)
    box_preds     : (B, H, W, A*7)
    dir_cls_preds : (B, H, W, A*num_dir_bins)
    anchors       : (N, 7) with N = H*W*A, flattened in (H, W, A) order
    in_dtype      : dtype the box/dir slabs are fed to the kernel with
                    (bf16 halves streaming traffic; math stays f32 in-kernel)
    out_dtype     : decoded-box dtype (f32 default; bf16 if downstream allows)
    anchor_tiles  : optional precomputed prepare_anchor_tiles() slab

    Returns (batch_cls_preds (B,N,num_class), batch_box_preds (B,N,7)).
    """
    b = cls_preds.shape[0]
    n = anchors.shape[0]

    batch_cls_preds = cls_preds.reshape(b, n, NUM_CLASS).astype(jnp.float32)

    ts, nbp, n_pad = tile_params(n, in_dtype)

    # TODO(synk): at production N the transpose/pad passes below move ~as many
    # HBM bytes as the kernel; fuse them into the producing conv head or have a
    # downstream Pallas NMS/top-k stage consume the (7,B,NB,128) slab directly.
    def to_tiles(x, c):                       # (B,H,W,A*c) -> (c, B, nbp, 128)
        x = x.reshape(b, n, c).astype(in_dtype)
        x = jnp.transpose(x, (2, 0, 1))       # (c, B, N)
        if n_pad > n:
            x = jnp.pad(x, ((0, 0), (0, 0), (0, n_pad - n)))
        return x.reshape(c, b, nbp, LANE)

    box_t = to_tiles(box_preds, CODE_SIZE)
    dir_t = to_tiles(dir_cls_preds, NUM_DIR_BINS)

    if anchor_tiles is None:
        anchor_tiles = prepare_anchor_tiles(anchors, n_pad)
    assert anchor_tiles.shape == (CODE_SIZE, nbp, LANE)

    decoded = pl.pallas_call(
        _decode_kernel,
        out_shape=jax.ShapeDtypeStruct((CODE_SIZE, b, nbp, LANE), out_dtype),
        grid_spec=pltpu.PrefetchScalarGridSpec(
            num_scalar_prefetch=0,
            grid=(nbp // ts,),
            in_specs=[
                pl.BlockSpec((CODE_SIZE, b, ts, LANE), lambda ni: (0, 0, ni, 0)),
                pl.BlockSpec((CODE_SIZE, ts, LANE), lambda ni: (0, ni, 0)),
                pl.BlockSpec((NUM_DIR_BINS, b, ts, LANE), lambda ni: (0, 0, ni, 0)),
            ],
            out_specs=pl.BlockSpec((CODE_SIZE, b, ts, LANE),
                                   lambda ni: (0, 0, ni, 0)),
        ),
        compiler_params=pltpu.CompilerParams(
            dimension_semantics=("parallel",),
            vmem_limit_bytes=VMEM_LIMIT_BYTES),
    )(box_t, anchor_tiles, dir_t)

    batch_box_preds = decoded.astype(jnp.float32).reshape(CODE_SIZE, b, n_pad)[:, :, :n]
    batch_box_preds = jnp.transpose(batch_box_preds, (1, 2, 0))   # (B, N, 7)
    return batch_cls_preds, batch_box_preds


# ------------------------- deterministic anchor setup --------------------------
def build_anchors():
    """Synthetic AnchorGenerator: (H, W, A, 7) flattened to (N, 7)."""
    pc_range = np.array([0.0, -8.0, -3.0, 16.0, 8.0, 1.0], dtype=np.float32)
    x_centers = np.linspace(pc_range[0], pc_range[3], W, dtype=np.float32)
    y_centers = np.linspace(pc_range[1], pc_range[4], H, dtype=np.float32)
    z_center = -1.0
    size = np.array([3.9, 1.6, 1.56], dtype=np.float32)   # dx, dy, dz
    rotations = np.array([0.0, np.pi / 2.0], dtype=np.float32)  # A = 2

    yy, xx = np.meshgrid(y_centers, x_centers, indexing="ij")   # (H, W)
    anchors = np.zeros((H, W, NUM_ANCHORS_PER_LOC, CODE_SIZE), dtype=np.float32)
    anchors[..., 0] = xx[:, :, None]
    anchors[..., 1] = yy[:, :, None]
    anchors[..., 2] = z_center
    anchors[..., 3] = size[0]
    anchors[..., 4] = size[1]
    anchors[..., 5] = size[2]
    anchors[..., 6] = rotations[None, None, :]
    return jnp.asarray(anchors.reshape(-1, CODE_SIZE))


# ------------------------------- JAX reference ---------------------------------
def _decode_ref(box, anc, dirp):
    xa, ya, za, dxa, dya, dza, ra = [anc[None, :, i] for i in range(7)]
    xt, yt, zt, dxt, dyt, dzt, rt = [box[..., i] for i in range(7)]
    diag = jnp.sqrt(dxa ** 2 + dya ** 2)
    xg = xt * diag + xa
    yg = yt * diag + ya
    zg = zt * dza + za
    dxg = jnp.exp(dxt) * dxa
    dyg = jnp.exp(dyt) * dya
    dzg = jnp.exp(dzt) * dza
    rg = rt + ra
    labels = jnp.argmax(dirp, axis=-1).astype(jnp.float32)
    val = rg - DIR_OFFSET
    dir_rot = val - jnp.floor(val / PERIOD + DIR_LIMIT_OFFSET) * PERIOD
    rg = dir_rot + DIR_OFFSET + PERIOD * labels
    return jnp.stack([xg, yg, zg, dxg, dyg, dzg, rg], axis=-1)


# ----------------------------------- main --------------------------------------
if __name__ == "__main__":
    key = jax.random.PRNGKey(0)
    k1, k2, k3 = jax.random.split(key, 3)

    # Simulated conv-head outputs, already permuted NCHW -> NHWC.
    cls_preds = jax.random.normal(k1, (B, H, W, NUM_ANCHORS_PER_LOC * NUM_CLASS),
                                  dtype=jnp.float32)
    box_preds = 0.1 * jax.random.normal(k2, (B, H, W, NUM_ANCHORS_PER_LOC * CODE_SIZE),
                                        dtype=jnp.float32)
    dir_cls_preds = jax.random.normal(k3, (B, H, W, NUM_ANCHORS_PER_LOC * NUM_DIR_BINS),
                                      dtype=jnp.float32)

    anchors = build_anchors()                                   # (512, 7)

    # Static anchor slab: precompute ONCE outside the per-step call (f32 path).
    ts_f32, nbp_f32, n_pad_f32 = tile_params(N_ANCHORS, jnp.float32)
    anc_tiles_f32 = prepare_anchor_tiles(anchors, n_pad_f32)

    # --- f32 path (matches PyTorch module semantics exactly) ---
    batch_cls_preds, batch_box_preds = generate_predicted_boxes(
        cls_preds, box_preds, dir_cls_preds, anchors,
        in_dtype=jnp.float32, out_dtype=jnp.float32, anchor_tiles=anc_tiles_f32)
    jax.block_until_ready(batch_box_preds)

    box_flat = box_preds.reshape(B, N_ANCHORS, CODE_SIZE)
    dir_flat = dir_cls_preds.reshape(B, N_ANCHORS, NUM_DIR_BINS)
    ref = _decode_ref(box_flat, anchors, dir_flat)
    np.testing.assert_allclose(np.asarray(batch_box_preds), np.asarray(ref),
                               rtol=1e-5, atol=1e-5)
    assert batch_cls_preds.shape == (B, N_ANCHORS, NUM_CLASS)
    assert batch_box_preds.shape == (B, N_ANCHORS, CODE_SIZE)

    # --- bf16-feed path (halves box/dir streaming traffic; math stays f32) ---
    _, batch_box_preds_bf16 = generate_predicted_boxes(
        cls_preds, box_preds, dir_cls_preds, anchors,
        in_dtype=jnp.bfloat16, out_dtype=jnp.float32)
    jax.block_until_ready(batch_box_preds_bf16)
    # reference with the same input quantization (keeps dir-argmax decisions equal)
    ref_bf16 = _decode_ref(box_flat.astype(jnp.bfloat16).astype(jnp.float32),
                           anchors,
                           dir_flat.astype(jnp.bfloat16).astype(jnp.float32))
    np.testing.assert_allclose(np.asarray(batch_box_preds_bf16), np.asarray(ref_bf16),
                               rtol=1e-4, atol=1e-4)

    # TODO(synk): loss heads (focal cls / smooth-L1 reg / dir CE) and
    # AxisAlignedTargetAssigner are training-only, data-dependent logic and are
    # not part of this inference kernel.
    print("KERNEL_OK")
</pallas_src>

<mosaic_0001>
module attributes {stable_mosaic.version = 11 : i64} {
  func.func @_decode_kernel(%arg0: i32, %arg1: memref<7x2x8x128xf32, #tpu.memory_space<vmem>>, %arg2: memref<7x8x128xf32, #tpu.memory_space<vmem>>, %arg3: memref<2x2x8x128xf32, #tpu.memory_space<vmem>>, %arg4: memref<7x2x8x128xf32, #tpu.memory_space<vmem>>) attributes {dimension_semantics = [#tpu.dimension_semantics<parallel>], iteration_bounds = array<i64: 1>, scalar_prefetch = 0 : i64, scratch_operands = 0 : i64, tpu.core_type = #tpu.core_type<tc>, window_params = [{transform_indices = @transform_0, window_bounds = array<i64: 7, 2, 8, 128>}, {transform_indices = @transform_1, window_bounds = array<i64: 7, 8, 128>}, {transform_indices = @transform_2, window_bounds = array<i64: 2, 2, 8, 128>}, {transform_indices = @transform_3, window_bounds = array<i64: 7, 2, 8, 128>}]} {
    %c0 = arith.constant 0 : index
    %c0_0 = arith.constant 0 : index
    %c0_1 = arith.constant 0 : index
    %0 = vector.load %arg2[%c0, %c0_0, %c0_1] : memref<7x8x128xf32, #tpu.memory_space<vmem>>, vector<1x8x128xf32>
    %1 = vector.shape_cast %0 : vector<1x8x128xf32> to vector<8x128xf32>
    %c1 = arith.constant 1 : index
    %c0_2 = arith.constant 0 : index
    %c0_3 = arith.constant 0 : index
    %2 = vector.load %arg2[%c1, %c0_2, %c0_3] : memref<7x8x128xf32, #tpu.memory_space<vmem>>, vector<1x8x128xf32>
    %3 = vector.shape_cast %2 : vector<1x8x128xf32> to vector<8x128xf32>
    %c2 = arith.constant 2 : index
    %c0_4 = arith.constant 0 : index
    %c0_5 = arith.constant 0 : index
    %4 = vector.load %arg2[%c2, %c0_4, %c0_5] : memref<7x8x128xf32, #tpu.memory_space<vmem>>, vector<1x8x128xf32>
    %5 = vector.shape_cast %4 : vector<1x8x128xf32> to vector<8x128xf32>
    %c3 = arith.constant 3 : index
    %c0_6 = arith.constant 0 : index
    %c0_7 = arith.constant 0 : index
    %6 = vector.load %arg2[%c3, %c0_6, %c0_7] : memref<7x8x128xf32, #tpu.memory_space<vmem>>, vector<1x8x128xf32>
    %7 = vector.shape_cast %6 : vector<1x8x128xf32> to vector<8x128xf32>
    %c4 = arith.constant 4 : index
    %c0_8 = arith.constant 0 : index
    %c0_9 = arith.constant 0 : index
    %8 = vector.load %arg2[%c4, %c0_8, %c0_9] : memref<7x8x128xf32, #tpu.memory_space<vmem>>, vector<1x8x128xf32>
    %9 = vector.shape_cast %8 : vector<1x8x128xf32> to vector<8x128xf32>
    %c5 = arith.constant 5 : index
    %c0_10 = arith.constant 0 : index
    %c0_11 = arith.constant 0 : index
    %10 = vector.load %arg2[%c5, %c0_10, %c0_11] : memref<7x8x128xf32, #tpu.memory_space<vmem>>, vector<1x8x128xf32>
    %11 = vector.shape_cast %10 : vector<1x8x128xf32> to vector<8x128xf32>
    %c6 = arith.constant 6 : index
    %c0_12 = arith.constant 0 : index
    %c0_13 = arith.constant 0 : index
    %12 = vector.load %arg2[%c6, %c0_12, %c0_13] : memref<7x8x128xf32, #tpu.memory_space<vmem>>, vector<1x8x128xf32>
    %13 = vector.shape_cast %12 : vector<1x8x128xf32> to vector<8x128xf32>
    %14 = arith.mulf %7, %7 : vector<8x128xf32>
    %15 = arith.mulf %9, %9 : vector<8x128xf32>
    %16 = arith.addf %14, %15 : vector<8x128xf32>
    %17 = math.sqrt %16 : vector<8x128xf32>
    %c0_14 = arith.constant 0 : index
    %c0_15 = arith.constant 0 : index
    %c0_16 = arith.constant 0 : index
    %c0_17 = arith.constant 0 : index
    %18 = vector.load %arg1[%c0_14, %c0_15, %c0_16, %c0_17] : memref<7x2x8x128xf32, #tpu.memory_space<vmem>>, vector<1x2x8x128xf32>
    %19 = vector.shape_cast %18 : vector<1x2x8x128xf32> to vector<2x8x128xf32>
    %20 = vector.shape_cast %17 : vector<8x128xf32> to vector<1x8x128xf32>
    %21 = vector.broadcast %20 : vector<1x8x128xf32> to vector<2x8x128xf32>
    %22 = arith.mulf %19, %21 : vector<2x8x128xf32>
    %23 = vector.shape_cast %1 : vector<8x128xf32> to vector<1x8x128xf32>
    %24 = vector.broadcast %23 : vector<1x8x128xf32> to vector<2x8x128xf32>
    %25 = arith.addf %22, %24 : vector<2x8x128xf32>
    %c0_18 = arith.constant 0 : index
    %c0_19 = arith.constant 0 : index
    %c0_20 = arith.constant 0 : index
    %c0_21 = arith.constant 0 : index
    %26 = vector.load %arg4[%c0_18, %c0_19, %c0_20, %c0_21] : memref<7x2x8x128xf32, #tpu.memory_space<vmem>>, vector<1x2x8x128xf32>
    %27 = vector.shape_cast %26 : vector<1x2x8x128xf32> to vector<2x8x128xf32>
    %28 = vector.shape_cast %25 : vector<2x8x128xf32> to vector<1x2x8x128xf32>
    tpu.vector_store %arg4[%c0_18, %c0_19, %c0_20, %c0_21], %28 {strides = array<i32>} : memref<7x2x8x128xf32, #tpu.memory_space<vmem>>, vector<1x2x8x128xf32>,
    %c1_22 = arith.constant 1 : index
    %c0_23 = arith.constant 0 : index
    %c0_24 = arith.constant 0 : index
    %c0_25 = arith.constant 0 : index
    %29 = vector.load %arg1[%c1_22, %c0_23, %c0_24, %c0_25] : memref<7x2x8x128xf32, #tpu.memory_space<vmem>>, vector<1x2x8x128xf32>
    %30 = vector.shape_cast %29 : vector<1x2x8x128xf32> to vector<2x8x128xf32>
    %31 = vector.shape_cast %17 : vector<8x128xf32> to vector<1x8x128xf32>
    %32 = vector.broadcast %31 : vector<1x8x128xf32> to vector<2x8x128xf32>
    %33 = arith.mulf %30, %32 : vector<2x8x128xf32>
    %34 = vector.shape_cast %3 : vector<8x128xf32> to vector<1x8x128xf32>
    %35 = vector.broadcast %34 : vector<1x8x128xf32> to vector<2x8x128xf32>
    %36 = arith.addf %33, %35 : vector<2x8x128xf32>
    %c1_26 = arith.constant 1 : index
    %c0_27 = arith.constant 0 : index
    %c0_28 = arith.constant 0 : index
    %c0_29 = arith.constant 0 : index
    %37 = vector.load %arg4[%c1_26, %c0_27, %c0_28, %c0_29] : memref<7x2x8x128xf32, #tpu.memory_space<vmem>>, vector<1x2x8x128xf32>
    %38 = vector.shape_cast %37 : vector<1x2x8x128xf32> to vector<2x8x128xf32>
    %39 = vector.shape_cast %36 : vector<2x8x128xf32> to vector<1x2x8x128xf32>
    tpu.vector_store %arg4[%c1_26, %c0_27, %c0_28, %c0_29], %39 {strides = array<i32>} : memref<7x2x8x128xf32, #tpu.memory_space<vmem>>, vector<1x2x8x128xf32>,
    %c2_30 = arith.constant 2 : index
    %c0_31 = arith.constant 0 : index
    %c0_32 = arith.constant 0 : index
    %c0_33 = arith.constant 0 : index
    %40 = vector.load %arg1[%c2_30, %c0_31, %c0_32, %c0_33] : memref<7x2x8x128xf32, #tpu.memory_space<vmem>>, vector<1x2x8x128xf32>
    %41 = vector.shape_cast %40 : vector<1x2x8x128xf32> to vector<2x8x128xf32>
    %42 = vector.shape_cast %11 : vector<8x128xf32> to vector<1x8x128xf32>
    %43 = vector.broadcast %42 : vector<1x8x128xf32> to vector<2x8x128xf32>
    %44 = arith.mulf %41, %43 : vector<2x8x128xf32>
    %45 = vector.shape_cast %5 : vector<8x128xf32> to vector<1x8x128xf32>
    %46 = vector.broadcast %45 : vector<1x8x128xf32> to vector<2x8x128xf32>
    %47 = arith.addf %44, %46 : vector<2x8x128xf32>
    %c2_34 = arith.constant 2 : index
    %c0_35 = arith.constant 0 : index
    %c0_36 = arith.constant 0 : index
    %c0_37 = arith.constant 0 : index
    %48 = vector.load %arg4[%c2_34, %c0_35, %c0_36, %c0_37] : memref<7x2x8x128xf32, #tpu.memory_space<vmem>>, vector<1x2x8x128xf32>
    %49 = vector.shape_cast %48 : vector<1x2x8x128xf32> to vector<2x8x128xf32>
    %50 = vector.shape_cast %47 : vector<2x8x128xf32> to vector<1x2x8x128xf32>
    tpu.vector_store %arg4[%c2_34, %c0_35, %c0_36, %c0_37], %50 {strides = array<i32>} : memref<7x2x8x128xf32, #tpu.memory_space<vmem>>, vector<1x2x8x128xf32>,
    %c3_38 = arith.constant 3 : index
    %c0_39 = arith.constant 0 : index
    %c0_40 = arith.constant 0 : index
    %c0_41 = arith.constant 0 : index
    %51 = vector.load %arg1[%c3_38, %c0_39, %c0_40, %c0_41] : memref<7x2x8x128xf32, #tpu.memory_space<vmem>>, vector<1x2x8x128xf32>
    %52 = vector.shape_cast %51 : vector<1x2x8x128xf32> to vector<2x8x128xf32>
    %53 = math.exp %52 : vector<2x8x128xf32>
    %54 = vector.shape_cast %7 : vector<8x128xf32> to vector<1x8x128xf32>
    %55 = vector.broadcast %54 : vector<1x8x128xf32> to vector<2x8x128xf32>
    %56 = arith.mulf %53, %55 : vector<2x8x128xf32>
    %c3_42 = arith.constant 3 : index
    %c0_43 = arith.constant 0 : index
    %c0_44 = arith.constant 0 : index
    %c0_45 = arith.constant 0 : index
    %57 = vector.load %arg4[%c3_42, %c0_43, %c0_44, %c0_45] : memref<7x2x8x128xf32, #tpu.memory_space<vmem>>, vector<1x2x8x128xf32>
    %58 = vector.shape_cast %57 : vector<1x2x8x128xf32> to vector<2x8x128xf32>
    %59 = vector.shape_cast %56 : vector<2x8x128xf32> to vector<1x2x8x128xf32>
    tpu.vector_store %arg4[%c3_42, %c0_43, %c0_44, %c0_45], %59 {strides = array<i32>} : memref<7x2x8x128xf32, #tpu.memory_space<vmem>>, vector<1x2x8x128xf32>,
    %c4_46 = arith.constant 4 : index
    %c0_47 = arith.constant 0 : index
    %c0_48 = arith.constant 0 : index
    %c0_49 = arith.constant 0 : index
    %60 = vector.load %arg1[%c4_46, %c0_47, %c0_48, %c0_49] : memref<7x2x8x128xf32, #tpu.memory_space<vmem>>, vector<1x2x8x128xf32>
    %61 = vector.shape_cast %60 : vector<1x2x8x128xf32> to vector<2x8x128xf32>
    %62 = math.exp %61 : vector<2x8x128xf32>
    %63 = vector.shape_cast %9 : vector<8x128xf32> to vector<1x8x128xf32>
    %64 = vector.broadcast %63 : vector<1x8x128xf32> to vector<2x8x128xf32>
    %65 = arith.mulf %62, %64 : vector<2x8x128xf32>
    %c4_50 = arith.constant 4 : index
    %c0_51 = arith.constant 0 : index
    %c0_52 = arith.constant 0 : index
    %c0_53 = arith.constant 0 : index
    %66 = vector.load %arg4[%c4_50, %c0_51, %c0_52, %c0_53] : memref<7x2x8x128xf32, #tpu.memory_space<vmem>>, vector<1x2x8x128xf32>
    %67 = vector.shape_cast %66 : vector<1x2x8x128xf32> to vector<2x8x128xf32>
    %68 = vector.shape_cast %65 : vector<2x8x128xf32> to vector<1x2x8x128xf32>
    tpu.vector_store %arg4[%c4_50, %c0_51, %c0_52, %c0_53], %68 {strides = array<i32>} : memref<7x2x8x128xf32, #tpu.memory_space<vmem>>, vector<1x2x8x128xf32>,
    %c5_54 = arith.constant 5 : index
    %c0_55 = arith.constant 0 : index
    %c0_56 = arith.constant 0 : index
    %c0_57 = arith.constant 0 : index
    %69 = vector.load %arg1[%c5_54, %c0_55, %c0_56, %c0_57] : memref<7x2x8x128xf32, #tpu.memory_space<vmem>>, vector<1x2x8x128xf32>
    %70 = vector.shape_cast %69 : vector<1x2x8x128xf32> to vector<2x8x128xf32>
    %71 = math.exp %70 : vector<2x8x128xf32>
    %72 = vector.shape_cast %11 : vector<8x128xf32> to vector<1x8x128xf32>
    %73 = vector.broadcast %72 : vector<1x8x128xf32> to vector<2x8x128xf32>
    %74 = arith.mulf %71, %73 : vector<2x8x128xf32>
    %c5_58 = arith.constant 5 : index
    %c0_59 = arith.constant 0 : index
    %c0_60 = arith.constant 0 : index
    %c0_61 = arith.constant 0 : index
    %75 = vector.load %arg4[%c5_58, %c0_59, %c0_60, %c0_61] : memref<7x2x8x128xf32, #tpu.memory_space<vmem>>, vector<1x2x8x128xf32>
    %76 = vector.shape_cast %75 : vector<1x2x8x128xf32> to vector<2x8x128xf32>
    %77 = vector.shape_cast %74 : vector<2x8x128xf32> to vector<1x2x8x128xf32>
    tpu.vector_store %arg4[%c5_58, %c0_59, %c0_60, %c0_61], %77 {strides = array<i32>} : memref<7x2x8x128xf32, #tpu.memory_space<vmem>>, vector<1x2x8x128xf32>,
    %c6_62 = arith.constant 6 : index
    %c0_63 = arith.constant 0 : index
    %c0_64 = arith.constant 0 : index
    %c0_65 = arith.constant 0 : index
    %78 = vector.load %arg1[%c6_62, %c0_63, %c0_64, %c0_65] : memref<7x2x8x128xf32, #tpu.memory_space<vmem>>, vector<1x2x8x128xf32>
    %79 = vector.shape_cast %78 : vector<1x2x8x128xf32> to vector<2x8x128xf32>
    %80 = vector.shape_cast %13 : vector<8x128xf32> to vector<1x8x128xf32>
    %81 = vector.broadcast %80 : vector<1x8x128xf32> to vector<2x8x128xf32>
    %82 = arith.addf %79, %81 : vector<2x8x128xf32>
    %c1_66 = arith.constant 1 : index
    %c0_67 = arith.constant 0 : index
    %c0_68 = arith.constant 0 : index
    %c0_69 = arith.constant 0 : index
    %83 = vector.load %arg3[%c1_66, %c0_67, %c0_68, %c0_69] : memref<2x2x8x128xf32, #tpu.memory_space<vmem>>, vector<1x2x8x128xf32>
    %84 = vector.shape_cast %83 : vector<1x2x8x128xf32> to vector<2x8x128xf32>
    %c0_70 = arith.constant 0 : index
    %c0_71 = arith.constant 0 : index
    %c0_72 = arith.constant 0 : index
    %c0_73 = arith.constant 0 : index
    %85 = vector.load %arg3[%c0_70, %c0_71, %c0_72, %c0_73] : memref<2x2x8x128xf32, #tpu.memory_space<vmem>>, vector<1x2x8x128xf32>
    %86 = vector.shape_cast %85 : vector<1x2x8x128xf32> to vector<2x8x128xf32>
    %87 = arith.cmpf ogt, %84, %86 : vector<2x8x128xf32>
    %cst = arith.constant 3.14159274 : f32
    %cst_74 = arith.constant 0.000000e+00 : f32
    %88 = vector.broadcast %cst : f32 to vector<2x8x128xf32>
    %89 = vector.broadcast %cst_74 : f32 to vector<2x8x128xf32>
    %90 = arith.select %87, %88, %89 : vector<2x8x128xi1>, vector<2x8x128xf32>
    %cst_75 = arith.constant 7.853900e-01 : f32
    %91 = vector.broadcast %cst_75 : f32 to vector<2x8x128xf32>
    %92 = arith.subf %82, %91 : vector<2x8x128xf32>
    %cst_76 = arith.constant 0.318309873 : f32
    %93 = vector.broadcast %cst_76 : f32 to vector<2x8x128xf32>
    %94 = arith.mulf %92, %93 : vector<2x8x128xf32>
    %cst_77 = arith.constant 0.000000e+00 : f32
    %95 = vector.broadcast %cst_77 : f32 to vector<2x8x128xf32>
    %96 = arith.addf %94, %95 : vector<2x8x128xf32>
    %97 = math.floor %96 : vector<2x8x128xf32>
    %cst_78 = arith.constant 3.14159274 : f32
    %98 = vector.broadcast %cst_78 : f32 to vector<2x8x128xf32>
    %99 = arith.mulf %97, %98 : vector<2x8x128xf32>
    %100 = arith.subf %92, %99 : vector<2x8x128xf32>
    %cst_79 = arith.constant 7.853900e-01 : f32
    %101 = vector.broadcast %cst_79 : f32 to vector<2x8x128xf32>
    %102 = arith.addf %100, %101 : vector<2x8x128xf32>
    %103 = arith.addf %102, %90 : vector<2x8x128xf32>
    %c6_80 = arith.constant 6 : index
    %c0_81 = arith.constant 0 : index
    %c0_82 = arith.constant 0 : index
    %c0_83 = arith.constant 0 : index
    %104 = vector.load %arg4[%c6_80, %c0_81, %c0_82, %c0_83] : memref<7x2x8x128xf32, #tpu.memory_space<vmem>>, vector<1x2x8x128xf32>
    %105 = vector.shape_cast %104 : vector<1x2x8x128xf32> to vector<2x8x128xf32>
    %106 = vector.shape_cast %103 : vector<2x8x128xf32> to vector<1x2x8x128xf32>
    tpu.vector_store %arg4[%c6_80, %c0_81, %c0_82, %c0_83], %106 {strides = array<i32>} : memref<7x2x8x128xf32, #tpu.memory_space<vmem>>, vector<1x2x8x128xf32>,
    return
  }
  func.func @transform_0(%arg0: i32) -> (i32, i32, i32, i32) {
    %c0_i32 = arith.constant 0 : i32
    %c0_i32_0 = arith.constant 0 : i32
    %c0_i32_1 = arith.constant 0 : i32
    %c0_i32_2 = arith.constant 0 : i32
    return %c0_i32, %c0_i32_0, %arg0, %c0_i32_1 : i32, i32, i32, i32
  }
  func.func @transform_1(%arg0: i32) -> (i32, i32, i32) {
    %c0_i32 = arith.constant 0 : i32
    %c0_i32_0 = arith.constant 0 : i32
    %c0_i32_1 = arith.constant 0 : i32
    return %c0_i32, %arg0, %c0_i32_0 : i32, i32, i32
  }
  func.func @transform_2(%arg0: i32) -> (i32, i32, i32, i32) {
    %c0_i32 = arith.constant 0 : i32
    %c0_i32_0 = arith.constant 0 : i32
    %c0_i32_1 = arith.constant 0 : i32
    %c0_i32_2 = arith.constant 0 : i32
    return %c0_i32, %c0_i32_0, %arg0, %c0_i32_1 : i32, i32, i32, i32
  }
  func.func @transform_3(%arg0: i32) -> (i32, i32, i32, i32) {
    %c0_i32 = arith.constant 0 : i32
    %c0_i32_0 = arith.constant 0 : i32
    %c0_i32_1 = arith.constant 0 : i32
    %c0_i32_2 = arith.constant 0 : i32
    return %c0_i32, %c0_i32_0, %arg0, %c0_i32_1 : i32, i32, i32, i32
  }
}

</mosaic_0001>

<bundles_post_ra>
// kernel: tpu_custom_call.1
= control target key start
LH: loop header
LB: loop body
LE: loop exit
PB: predicated region body
PF: predicated region fallthrough
CT: control target
= control target key end

     0   :  { %8 = vsyncpa [#allocation3], 0  ;;  %s433_s0 = inlined_call_operand.hbm [shape: f32[7,2,8,128], index: 0, kind: input, shape index: {}]   ;;  %s434_s1 = inlined_call_operand.hbm [shape: f32[7,8,128], index: 1, kind: input, shape index: {}]   ;;  %s435_s2 = inlined_call_operand.hbm [shape: f32[2,2,8,128], index: 2, kind: input, shape index: {}]   ;;  %s436_s3 = inlined_call_operand.hbm [shape: f32[7,2,8,128], index: 3, kind: output, shape index: {}]  }
   0x1   :  { %9 = vsyncpa [#allocation6], 0 }
   0x2   :  { %10 = vsyncpa [#allocation4], 0  ;;  %s311_s12 = smov [#allocation5]   ;;  %s312_s14 = smov [#allocation2]  }
   0x3   :  { %s28_s13 = sshll.u32 %s311_s12, 4  ;;  %s16_s15 = sshll.u32 %s312_s14, 4  ;;  %s29_s13 = int_to_ptr.vmem [resolvable:$true] %s28_s13  ;;  %s338_s15 = int_to_ptr.vmem [resolvable:$true] %s16_s15 }
   0x4   :  { %s217_s18 = scalar_lea.hbm %s434_s1, 896 }
   0x5   :  { %p218_p0 = scmp.ne.s32.totalorder %s434_s1, %s217_s18  ;;  %p221_p1 = scmp.lt.u32.totalorder %s217_s18, %s434_s1 }
   0x7   :  { %p223_p2 = pnand %p221_p1, %p218_p0 }
   0x9   :  { %226 = shalt.err (!%p223_p2)
}
   0xa   :  { %s227_s23 = scalar_lea.vmem %s29_s13, 896  ;;  %p232_p4 = scmp.lt.s32.totalorder %s29_s13, %s29_s13 }
   0xb   :  { %p228_p3 = scmp.ne.s32.totalorder %s29_s13, %s227_s23  ;;  %p233_p5 = scmp.lt.s32.totalorder %s227_s23, %s227_s23 }
   0xd   :  { %p234_p6 = por %p233_p5, %p232_p4 }
   0xf   :  { %p235_p7 = pnand %p234_p6, %p228_p3 }
  0x11   :  { %238 = shalt.err (!%p235_p7)
}
  0x12   :  { %s313_s24 = smov 128   ;;  %s314_s25 = smov 8  }
  0x13   :  { %34 = dma.hbm_to_vmem [thread:$0]  %s434_s1, 896, %s29_s13, [#allocation6], %s313_s24, %s313_s24, %s314_s25  }
  0x14   :  { %s239_s30 = scalar_lea.hbm %s433_s0, 1792 }
  0x15   :  { %p240_p8 = scmp.ne.s32.totalorder %s433_s0, %s239_s30  ;;  %p243_p9 = scmp.lt.u32.totalorder %s239_s30, %s433_s0 }
  0x17   :  { %p245_p10 = pnand %p243_p9, %p240_p8 }
  0x19   :  { %248 = shalt.err (!%p245_p10)
}
  0x1a   :  { %s249_s8 = scalar_lea.vmem %s338_s15, 1792  ;;  %p254_p12 = scmp.lt.s32.totalorder %s338_s15, %s338_s15 }
  0x1b   :  { %p250_p11 = scmp.ne.s32.totalorder %s338_s15, %s249_s8  ;;  %p255_p13 = scmp.lt.s32.totalorder %s249_s8, %s249_s8 }
  0x1d   :  { %p256_p0 = por %p255_p13, %p254_p12 }
  0x1f   :  { %p257_p1 = pnand %p256_p0, %p250_p11 }
  0x21   :  { %260 = shalt.err (!%p257_p1)
}
  0x22   :  { %22 = dma.hbm_to_vmem [thread:$0]  %s433_s0, 1792, %s338_s15, [#allocation3], %s313_s24, %s313_s24, %s314_s25  }
  0x23   :  { %s315_s10 = smov [#allocation7]   ;;  %s261_s14 = scalar_lea.hbm %s435_s2, 512 }
  0x24   :  { %s40_s11 = sshll.u32 %s315_s10, 4  ;;  %p262_p2 = scmp.ne.s32.totalorder %s435_s2, %s261_s14  ;;  %s41_s11 = int_to_ptr.vmem [resolvable:$true] %s40_s11 }
  0x25   :  { %p265_p3 = scmp.lt.u32.totalorder %s261_s14, %s435_s2 }
  0x27   :  { %p267_p4 = pnand %p265_p3, %p262_p2 }
  0x29   :  { %270 = shalt.err (!%p267_p4)
}
  0x2a   :  { %s271_s20 = scalar_lea.vmem %s41_s11, 512  ;;  %p276_p6 = scmp.lt.s32.totalorder %s41_s11, %s41_s11 }
  0x2b   :  { %p272_p5 = scmp.ne.s32.totalorder %s41_s11, %s271_s20  ;;  %p277_p7 = scmp.lt.s32.totalorder %s271_s20, %s271_s20 }
  0x2d   :  { %p278_p8 = por %p277_p7, %p276_p6 }
  0x2f   :  { %p279_p9 = pnand %p278_p8, %p272_p5 }
  0x31   :  { %282 = shalt.err (!%p279_p9)
}
  0x32   :  { %46 = dma.hbm_to_vmem [thread:$0]  %s435_s2, 512, %s41_s11, [#allocation6], %s313_s24, %s313_s24, %s314_s25  }
  0x33   :  { %305 = dma.done.wait [#allocation3], 1792  }
  0x34   :  { %306 = vsyncadd [#allocation3], 4294965504 }
  0x35   :  { %307 = dma.done.wait [#allocation6], 1408  }
  0x36   :  { %308 = vsyncadd [#allocation6], 4294965888  ;;  %v390_v0 = vld [vmem:[#allocation5 + $0x18] sm:$0xff]  ;;  %v392_v1 = vld [vmem:[#allocation5 + $0x20] sm:$0xff]  ;;  %v316_v52 = vmov 0.0   ;;  %s317_s2 = smov [#allocation8]  }
  0x37   :  { %v69_v2 = vmul.f32 %v390_v0, %v390_v0  ;;  %v70_v3 = vmul.f32 %v392_v1, %v392_v1  ;;  %v60_v4 = vld [vmem:[#allocation5 + $0x10] sm:$0xff]  ;;  %v400_v6 = vld [vmem:[#allocation5 + $0x28] sm:$0xff]  ;;  %v99_v8 = vld [vmem:[#allocation2 + $0x28] sm:$0xff]  ;;  %s181_s21 = sshll.u32 %s317_s2, 4  ;;  %s182_s21 = int_to_ptr.vmem [resolvable:$true] %s181_s21 }
  0x38   :  { %v98_v7 = vld [vmem:[#allocation2 + $0x20] sm:$0xff]  ;;  %v101_v10 = vmul.f32 %v99_v8, %v400_v6  ;;  %v108_v11 = vld [vmem:[#allocation2 + $0x30] sm:$0xff]  ;;  %v109_v12 = vld [vmem:[#allocation2 + $0x38] sm:$0xff]  ;;  %s283_s22 = scalar_lea.vmem %s182_s21, 1792  ;;  %p288_p11 = scmp.lt.s32.totalorder %s182_s21, %s182_s21 }
  0x39   :  { %v398_v5 = vadd.f32 %v70_v3, %v69_v2  ;;  %v100_v9 = vmul.f32 %v98_v7, %v400_v6  ;;  %v120_v13 = vld [vmem:[#allocation2 + $0x40] sm:$0xff]  ;;  %v121_v14 = vld [vmem:[#allocation2 + $0x48] sm:$0xff]  ;;  %v132_v15 = vld [vmem:[#allocation2 + $0x50] sm:$0xff]  ;;  %v110_v19 = vmul.f32 1.442695, %v108_v11  ;;  %p284_p10 = scmp.ne.s32.totalorder %s182_s21, %s283_s22  ;;  %p289_p12 = scmp.lt.s32.totalorder %s283_s22, %s283_s22 }
  0x3a   :  { %v133_v16 = vld [vmem:[#allocation2 + $0x58] sm:$0xff]  ;;  %v103_v18 = vadd.f32 %v101_v10, %v60_v4  ;;  %v112_v20 = vmul.f32 1.442695, %v109_v12  ;;  %v68_v21 = vld [vmem:[#allocation5 + $0x30] sm:$0xff]  ;;  %v122_v23 = vmul.f32 1.442695, %v120_v13 }
  0x3b   :  { %203 = vrsqrt.f32 %v398_v5  ;;  %v102_v17 = vadd.f32 %v100_v9, %v60_v4  ;;  %v144_v22 = vld [vmem:[#allocation2 + $0x60] sm:$0xff]  ;;  %v124_v24 = vmul.f32 1.442695, %v121_v14  ;;  %v134_v26 = vmul.f32 1.442695, %v132_v15  ;;  %v145_v27 = vld [vmem:[#allocation2 + $0x68] sm:$0xff]  ;;  %p290_p13 = por %p289_p12, %p288_p11 }
  0x3c   :  { %v146_v25 = vadd.f32 %v144_v22, %v68_v21  ;;  %106 = vst [vmem:[#allocation8 + $0x28] sm:$0xff] %v103_v18  ;;  %205 = vpow2.f32 %v110_v19  ;;  %v136_v28 = vmul.f32 1.442695, %v133_v16  ;;  %v147_v30 = vadd.f32 %v145_v27, %v68_v21  ;;  %v149_v31 = vld [vmem:[#allocation7 + $0x10] sm:$0xff]  ;;  %v151_v34 = vld [vmem:[#allocation7] sm:$0xff]  ;;  %v150_v35 = vld [vmem:[#allocation7 + $0x18] sm:$0xff] }
  0x3d   :  { %105 = vst [vmem:[#allocation8 + $0x20] sm:$0xff] %v102_v17  ;;  %207 = vpow2.f32 %v112_v20  ;;  %v152_v36 = vld [vmem:[#allocation7 + $0x8] sm:$0xff]  ;;  %vm74_vm0 = vcmp.eq.f32.partialorder %v398_v5, inf  ;;  %v77_v39 = vand.u32 2147483648, %v398_v5  ;;  %vm153_vm1 = vcmp.gt.f32.partialorder %v149_v31, %v151_v34  ;;  %v79_v44 = vld [vmem:[#allocation2] sm:$0xff]  ;;  %v80_v45 = vld [vmem:[#allocation2 + $0x8] sm:$0xff]  ;;  %p291_p0 = pnand %p290_p13, %p284_p10 }
  0x3e   :  { %v194_v29 = vadd.f32 -0.78539, %v146_v25  ;;  %209 = vpow2.f32 %v122_v23  ;;  %v195_v33 = vadd.f32 -0.78539, %v147_v30  ;;  %vm154_vm2 = vcmp.gt.f32.partialorder %v150_v35, %v152_v36  ;;  %v88_v46 = vld [vmem:[#allocation2 + $0x10] sm:$0xff]  ;;  %v89_v47 = vld [vmem:[#allocation2 + $0x18] sm:$0xff] }
  0x3f   :  { %211 = vpow2.f32 %v124_v24  ;;  %vm76_vm3 = vcmp.eq.f32.partialorder %v398_v5, 0.0  ;;  %v155_v53 = vsel %vm153_vm1, 3.1415927, %v316_v52  ;;  %v156_v54 = vsel %vm154_vm2, 3.1415927, %v316_v52  ;;  %v56_v56 = vld [vmem:[#allocation5] sm:$0xff] }
  0x40   :  { %v159_v32 = vmul.f32 0.31830987, %v194_v29  ;;  %213 = vpow2.f32 %v134_v26  ;;  %v160_v38 = vmul.f32 0.31830987, %v195_v33  ;;  %v58_v58 = vld [vmem:[#allocation5 + $0x8] sm:$0xff] }
  0x41   :  { %215 = vpow2.f32 %v136_v28 }
  0x42   :  { %v163_v37 = vfloor.f32 %v159_v32  ;;  %v164_v42 = vfloor.f32 %v160_v38 }
  0x44   :  { %v165_v41 = vmul.f32 3.1415927, %v163_v37  ;;  %v166_v49 = vmul.f32 3.1415927, %v164_v42 }
  0x45   :  { %v204_v40 = vpop.eup %203 }
  0x46   :  { %v73_v43 = vmul.f32 %v204_v40, %v398_v5  ;;  %v167_v48 = vsub.f32 %v194_v29, %v165_v41  ;;  %v206_v50 = vpop.eup %205  ;;  %v168_v61 = vsub.f32 %v195_v33, %v166_v49 }
  0x47   :  { %v208_v55 = vpop.eup %207  ;;  %v114_v59 = vmul.f32 %v206_v50, %v390_v0 }
  0x48   :  { %v75_v51 = vsel %vm74_vm0, %v398_v5, %v73_v43  ;;  %v169_v60 = vadd.f32 0.78539, %v167_v48  ;;  %v210_v62 = vpop.eup %209  ;;  %v115_v5 = vmul.f32 %v208_v55, %v390_v0  ;;  %v170_v10 = vadd.f32 0.78539, %v168_v61 }
  0x49   :  { %v78_v57 = vsel %vm76_vm3, %v77_v39, %v75_v51  ;;  %v212_v7 = vpop.eup %211  ;;  %117 = vst [vmem:[#allocation8 + $0x30] sm:$0xff] %v114_v59  ;;  %v126_v8 = vmul.f32 %v210_v62, %v392_v1 }
  0x4a   :  { %v81_v63 = vmul.f32 %v79_v44, %v78_v57  ;;  %v82_v2 = vmul.f32 %v80_v45, %v78_v57  ;;  %v90_v3 = vmul.f32 %v88_v46, %v78_v57  ;;  %v91_v4 = vmul.f32 %v89_v47, %v78_v57  ;;  %v214_v11 = vpop.eup %213  ;;  %118 = vst [vmem:[#allocation8 + $0x38] sm:$0xff] %v115_v5 }
  0x4b   :  { %v171_v9 = vadd.f32 %v169_v60, %v155_v53  ;;  %v216_v16 = vpop.eup %215  ;;  %129 = vst [vmem:[#allocation8 + $0x40] sm:$0xff] %v126_v8  ;;  %v127_v17 = vmul.f32 %v212_v7, %v392_v1  ;;  %v138_v18 = vmul.f32 %v214_v11, %v400_v6  ;;  %v172_v0 = vadd.f32 %v170_v10, %v156_v54 }
  0x4c   :  { %v83_v12 = vadd.f32 %v81_v63, %v56_v56  ;;  %v84_v13 = vadd.f32 %v82_v2, %v56_v56  ;;  %v92_v14 = vadd.f32 %v90_v3, %v58_v58  ;;  %v93_v15 = vadd.f32 %v91_v4, %v58_v58 }
  0x4d   :  { %174 = vst [vmem:[#allocation8 + $0x60] sm:$0xff] %v171_v9  ;;  %v139_v19 = vmul.f32 %v216_v16, %v400_v6  ;;  %130 = vst [vmem:[#allocation8 + $0x48] sm:$0xff] %v127_v17 }
  0x4e   :  { %85 = vst [vmem:[#allocation8] sm:$0xff] %v83_v12  ;;  %86 = vst [vmem:[#allocation8 + $0x8] sm:$0xff] %v84_v13 }
  0x4f   :  { %95 = vst [vmem:[#allocation8 + $0x10] sm:$0xff] %v92_v14  ;;  %96 = vst [vmem:[#allocation8 + $0x18] sm:$0xff] %v93_v15 }
  0x50   :  { %141 = vst [vmem:[#allocation8 + $0x50] sm:$0xff] %v138_v18  ;;  %175 = vst [vmem:[#allocation8 + $0x68] sm:$0xff] %v172_v0 }
  0x51   :  { %142 = vst [vmem:[#allocation8 + $0x58] sm:$0xff] %v139_v19 }
  0x52   :  { %294 = shalt.err (!%p291_p0)
}
  0x53   :  { %s295_s27 = scalar_lea.hbm %s436_s3, 1792 }
  0x54   :  { %p296_p1 = scmp.ne.s32.totalorder %s436_s3, %s295_s27  ;;  %p299_p2 = scmp.lt.u32.totalorder %s295_s27, %s436_s3 }
  0x56   :  { %p301_p3 = pnand %p299_p2, %p296_p1 }
  0x58   :  { %304 = shalt.err (!%p301_p3)
}
  0x59   :  { %187 = dma.vmem_to_hbm [thread:$0]  %s182_s21, 1792, %s436_s3, [#allocation4], %s313_s24, %s313_s24, %s314_s25  }
  0x5a   :  { %309 = dma.done.wait [#allocation4], 1792  }
  0x5b   :  { %310 = vsyncadd [#allocation4], 4294965504 }
  0x5c   :  { %191 = vsyncpa [#allocation3], 1 }
  0x5d   :  { %192 = vsyncpa [#allocation6], 1 }
  0x5e   :  { %193 = vsyncpa [#allocation4], 1 }

</bundles_post_ra>
